<compile_context>
chip_gen: v7x
topology: tpu7x:2x2x1
jax: 0.10.0
libtpu: 0.0.40
codegen_flags: <defaults>
</compile_context>

<pallas_src>
import math
import numpy as np
import jax
import jax.numpy as jnp
from jax.experimental import pallas as pl
from jax.experimental.pallas import tpu as pltpu


# ------------------------- Pallas kernel (hot path) -------------------------
def _group_matmul_kernel(w_ref, f_ref, o_ref):
    # w_ref: (1, OC, K)  bf16   (tiny, stays resident across the M axis)
    # f_ref: (1, K, TM)  bf16   (lane axis = TM, dense loads)
    # o_ref: (1, OC, TM) bf16   (lane axis = TM, unmasked full-width stores)
    o_ref[0] = jnp.dot(
        w_ref[0], f_ref[0], preferred_element_type=jnp.float32
    ).astype(o_ref.dtype)


def _round_up(x, m):
    return -(-x // m) * m


def _pick_tm(m, g, cap=32768, min_steps=2):
    """Pick the M tile.  VMEM is not the constraint (a few MiB at the cap vs
    >=16 MiB scoped on every generation); the ~0.35us fixed grid-step overhead
    is, so take the biggest multiple-of-128 tile up to `cap`.  Only shrink if
    the total number of grid steps (G * ceil(M/TM)) would drop below
    `min_steps` (>=2 keeps both v7x TensorCores busy; G = cycle^2 usually
    covers this already).  M is padded UP to a multiple of the chosen TM by
    the caller -- no divisor search."""
    tm = min(cap, _round_up(max(m, 1), 128))
    if g < min_steps:
        steps_needed = -(-min_steps // max(g, 1))
        tm = min(tm, max(128, _round_up(-(-m // steps_needed), 128)))
    return tm


def group_matmul(feats, weights, tm, out_dtype=jnp.bfloat16):
    """feats (G, K, M) bf16, weights (G, OC, K) bf16 -> out (G, OC, M) bf16."""
    G, K, M = feats.shape
    _, OC, _ = weights.shape
    assert M % tm == 0

    # Explicit VMEM budget with headroom (v5e's scoped default is only 16 MiB).
    out_itemsize = jnp.dtype(out_dtype).itemsize
    buf_bytes = (
        2 * K * tm * feats.dtype.itemsize      # double-buffered feats tile
        + 2 * OC * tm * out_itemsize           # double-buffered out tile
        + 2 * OC * K * weights.dtype.itemsize  # weights block
    )
    vmem_limit = int(min(max(int(1.5 * buf_bytes) + (4 << 20), 16 << 20), 48 << 20))

    return pl.pallas_call(
        _group_matmul_kernel,
        out_shape=jax.ShapeDtypeStruct((G, OC, M), out_dtype),
        grid=(G, M // tm),  # M innermost: weights block re-DMA'd only on g change
        in_specs=[
            pl.BlockSpec((1, OC, K), lambda g, m: (g, 0, 0)),
            pl.BlockSpec((1, K, tm), lambda g, m: (g, 0, m)),
        ],
        out_specs=pl.BlockSpec((1, OC, tm), lambda g, m: (g, 0, m)),
        compiler_params=pltpu.CompilerParams(
            dimension_semantics=("parallel", "parallel"),
            vmem_limit_bytes=vmem_limit,
        ),
    )(weights, feats)


# ------------------------- host-side index / glue helpers -------------------------
def get_cirlen(scale):
    x = y = None
    for i in (10, 100, 1000, 10000):
        x = i
        y = scale * x
        if y - math.floor(y) == 0:
            break
    g = math.gcd(int(round(x)), int(round(y)))
    cyc = int(y // g)
    if cyc > 128:  # guard: G = cycle^2 weight sets would explode
        raise ValueError(f"cycle={cyc} too large for scale={scale}")
    return cyc, int(x // g)


def scale2pos_mat(scale, cycle):
    h = np.arange(cycle, dtype=np.float32) * (1.0 / scale)
    w = np.arange(cycle, dtype=np.float32) * (1.0 / scale)
    off_h = h - np.floor(h)
    off_w = w - np.floor(w)
    oh = np.broadcast_to(off_h[:, None], (cycle, cycle))
    ow = np.broadcast_to(off_w[None, :], (cycle, cycle))
    pos = np.stack([oh, ow], axis=-1).reshape(-1, 2)
    sc = np.full((pos.shape[0], 1), 1.0 / scale, dtype=np.float32)
    return np.concatenate([sc, pos], axis=-1).astype(np.float32)  # (cycle^2, 3)


def _proj_positions(out_len, scale, scale_int):
    # reproduces matmask_made: position of each output row/col in the
    # scale_int-upsampled grid (coord*scale_int + occurrence_index)
    coords = np.arange(out_len, dtype=np.float64)
    coords[-1] -= 0.1
    coords = np.floor(coords / scale).astype(np.int64)
    pos = np.zeros(out_len, dtype=np.int64)
    prev, sca = -1, 0
    for i, c in enumerate(coords):
        if c != prev:
            prev, sca = c, 0
        pos[i] = c * scale_int + sca
        sca += 1
    return pos


def _gather_indices(out_len, scale, scale_int, in_len):
    """Row/col indices (3, out_len) into a 1-px zero-padded input axis (len+2),
    for the 3 dilated (dilation=2) unfold taps, gathering straight from the
    ORIGINAL input (the NN upsample is folded into the index math)."""
    pos_up = _proj_positions(out_len, scale, scale_int)  # coords in upsampled grid
    idx = []
    for off in (-2, 0, 2):
        r = pos_up + off
        ii = np.where(
            r < 0, 0,
            np.where(r >= in_len * scale_int, in_len + 1, r // scale_int + 1),
        )
        idx.append(ii)
    return np.stack(idx, axis=0).astype(np.int32)  # (3, out_len)


# ------------------------- parameters (deterministic, synthetic) -------------------------
def init_params(key, inC, outC, k=3):
    feat_num = 3
    kdim = k * k * inC * outC
    k1, k2, k3, k4 = jax.random.split(key, 4)
    return {
        "W1": jax.random.normal(k1, (feat_num, 256), jnp.float32) * 0.2,
        "b1": jax.random.normal(k2, (256,), jnp.float32) * 0.1,
        "W2": jax.random.normal(k3, (256, kdim), jnp.float32) * 0.05,
        "b2": jax.random.normal(k4, (kdim,), jnp.float32) * 0.05,
        "ln_g": jnp.ones((k * k * inC,), jnp.float32),
        "ln_b": jnp.zeros((k * k * inC,), jnp.float32),
    }


def meta_weights(params, posmat, cycle, inC, outC):
    # Fea2Weight: Linear(3,256) -> ReLU -> Linear(256, 9*inC*outC)
    h = jnp.maximum(posmat @ params["W1"] + params["b1"], 0.0)
    w = h @ params["W2"] + params["b2"]                   # (G, 9*inC*outC)
    G = cycle * cycle
    w = w.reshape(G, outC, 9 * inC)
    # LayerNorm over last dim (eps = 1e-5) then /inC, as in the module
    mu = jnp.mean(w, axis=-1, keepdims=True)
    var = jnp.mean((w - mu) ** 2, axis=-1, keepdims=True)
    w = (w - mu) / jnp.sqrt(var + 1e-5)
    w = w * params["ln_g"] + params["ln_b"]
    w = w / inC
    return w                                              # (G, OC, K), K = 9*inC


# ------------------------- forward -------------------------
def upsample_forward(params, x, scale, inC, outC):
    N, C, H, W = x.shape
    if C != inC:
        raise Exception("inC!=self.inC")
    scale_r = round(float(scale), 4)
    scale_int = math.ceil(scale_r)
    outH = math.ceil(scale_r * H)
    outW = math.ceil(scale_r * W)
    cycle = get_cirlen(scale_r)[0]

    # per-phase meta weights (G, OC, K) -- tiny, compute in f32, cast once
    posmat = jnp.asarray(scale2pos_mat(scale_r, cycle))
    weights = meta_weights(params, posmat, cycle, inC, outC).astype(jnp.bfloat16)

    # --- feature extraction (plain-JAX glue, all in bf16: dilated 3x3 unfold
    #     gather straight from the original input, no scale_int^2 NN-upsample blowup) ---
    x_bf = x.astype(jnp.bfloat16)
    x_pad = jnp.pad(x_bf, ((0, 0), (0, 0), (1, 1), (1, 1)))     # (N, C, H+2, W+2)
    RI = _gather_indices(outH, scale_r, scale_int, H)           # (3, outH)
    CI = _gather_indices(outW, scale_r, scale_int, W)           # (3, outW)
    g = x_pad[:, :, RI, :]                                      # (N, C, 3, outH, W+2)
    g = g[:, :, :, :, CI]                                       # (N, C, 3, outH, 3, outW)

    K = 9 * C
    outH_pad = -(-outH // cycle) * cycle
    outW_pad = -(-outW // cycle) * cycle
    g = jnp.pad(
        g, ((0, 0), (0, 0), (0, 0), (0, outH_pad - outH), (0, 0), (0, outW_pad - outW))
    )
    Hb, Wb = outH_pad // cycle, outW_pad // cycle
    # (n, c, kh, hb, ph, kw, wb, pw) -> (ph, pw, c, kh, kw, n, hb, wb)
    g = g.reshape(N, C, 3, Hb, cycle, 3, Wb, cycle)
    f = jnp.transpose(g, (4, 7, 1, 2, 5, 0, 3, 6)).reshape(cycle * cycle, K, N * Hb * Wb)

    # Pick the tile first, then pad M up to a multiple of it (no divisor search).
    M = N * Hb * Wb
    G = cycle * cycle
    TM = _pick_tm(M, G)
    M_pad = _round_up(M, TM)
    f = jnp.pad(f, ((0, 0), (0, 0), (0, M_pad - M)))

    out = group_matmul(f, weights, tm=TM)                        # (G, OC, M_pad) bf16

    out = out[:, :, :M].reshape(cycle, cycle, outC, N, Hb, Wb)
    out = jnp.transpose(out, (3, 2, 4, 0, 5, 1)).reshape(N, outC, outH_pad, outW_pad)
    # Cast back to f32 to match the PyTorch module's output dtype (bf16 is
    # kept through the kernel + de-interleave to halve that HBM traffic).
    return out[:, :, :outH, :outW].astype(jnp.float32)


if __name__ == "__main__":
    inC, outC = 4, 3
    N, H, W = 2, 16, 16
    scale = 2.0

    key = jax.random.PRNGKey(0)
    kx, kp = jax.random.split(key)
    x = jax.random.normal(kx, (N, inC, H, W), jnp.float32)   # NCHW, like PyTorch
    params = init_params(kp, inC, outC)

    y = upsample_forward(params, x, scale, inC, outC)
    y = jax.block_until_ready(y)
    assert y.shape == (N, outC, math.ceil(scale * H), math.ceil(scale * W))
    assert bool(jnp.all(jnp.isfinite(y)))
    print("KERNEL_OK")
</pallas_src>

<mosaic_0001>
module attributes {stable_mosaic.version = 11 : i64} {
  func.func @_group_matmul_kernel(%arg0: i32, %arg1: i32, %arg2: memref<1x3x36xbf16, #tpu.memory_space<vmem>>, %arg3: memref<1x36x512xbf16, #tpu.memory_space<vmem>>, %arg4: memref<1x3x512xbf16, #tpu.memory_space<vmem>>) attributes {dimension_semantics = [#tpu.dimension_semantics<parallel>, #tpu.dimension_semantics<parallel>], iteration_bounds = array<i64: 4, 1>, scalar_prefetch = 0 : i64, scratch_operands = 0 : i64, tpu.core_type = #tpu.core_type<tc>, window_params = [{transform_indices = @transform_0, window_bounds = array<i64: 1, 3, 36>}, {transform_indices = @transform_1, window_bounds = array<i64: 1, 36, 512>}, {transform_indices = @transform_2, window_bounds = array<i64: 1, 3, 512>}]} {
    %c0 = arith.constant 0 : index
    %c0_0 = arith.constant 0 : index
    %c0_1 = arith.constant 0 : index
    %0 = vector.load %arg2[%c0, %c0_0, %c0_1] : memref<1x3x36xbf16, #tpu.memory_space<vmem>>, vector<1x3x36xbf16>
    %1 = vector.shape_cast %0 : vector<1x3x36xbf16> to vector<3x36xbf16>
    %c0_2 = arith.constant 0 : index
    %c0_3 = arith.constant 0 : index
    %c0_4 = arith.constant 0 : index
    %2 = vector.load %arg3[%c0_2, %c0_3, %c0_4] : memref<1x36x512xbf16, #tpu.memory_space<vmem>>, vector<1x36x512xbf16>
    %3 = vector.shape_cast %2 : vector<1x36x512xbf16> to vector<36x512xbf16>
    %cst = arith.constant dense<0.000000e+00> : vector<3x512xf32>
    %4 = tpu.matmul %1, %3, %cst {dimension_numbers = #tpu.dot_dimension_numbers<[1], [0], [0], [1], [0, 0, 1, 1], [], []>} : vector<3x36xbf16>, vector<36x512xbf16>, vector<3x512xf32> -> vector<3x512xf32>
    %5 = arith.truncf %4 : vector<3x512xf32> to vector<3x512xbf16>
    %c0_5 = arith.constant 0 : index
    %c0_6 = arith.constant 0 : index
    %c0_7 = arith.constant 0 : index
    %6 = vector.load %arg4[%c0_5, %c0_6, %c0_7] : memref<1x3x512xbf16, #tpu.memory_space<vmem>>, vector<1x3x512xbf16>
    %7 = vector.shape_cast %6 : vector<1x3x512xbf16> to vector<3x512xbf16>
    %8 = vector.shape_cast %5 : vector<3x512xbf16> to vector<1x3x512xbf16>
    tpu.vector_store %arg4[%c0_5, %c0_6, %c0_7], %8 {strides = array<i32>} : memref<1x3x512xbf16, #tpu.memory_space<vmem>>, vector<1x3x512xbf16>,
    return
  }
  func.func @transform_0(%arg0: i32, %arg1: i32) -> (i32, i32, i32) {
    %c0_i32 = arith.constant 0 : i32
    %c0_i32_0 = arith.constant 0 : i32
    %c0_i32_1 = arith.constant 0 : i32
    return %arg0, %c0_i32, %c0_i32_0 : i32, i32, i32
  }
  func.func @transform_1(%arg0: i32, %arg1: i32) -> (i32, i32, i32) {
    %c0_i32 = arith.constant 0 : i32
    %c0_i32_0 = arith.constant 0 : i32
    return %arg0, %c0_i32, %arg1 : i32, i32, i32
  }
  func.func @transform_2(%arg0: i32, %arg1: i32) -> (i32, i32, i32) {
    %c0_i32 = arith.constant 0 : i32
    %c0_i32_0 = arith.constant 0 : i32
    return %arg0, %c0_i32, %arg1 : i32, i32, i32
  }
}

</mosaic_0001>

<bundles_post_ra>
// kernel: tpu_custom_call.1
= control target key start
LH: loop header
LB: loop body
LE: loop exit
PB: predicated region body
PF: predicated region fallthrough
CT: control target
= control target key end

     0   :  { %s618_s9 = smov 0   ;;  %s620_s10 = smov 0   ;;  %s676_s0 = inlined_call_operand.vmem [shape: bf16[4,3,36], index: 0, kind: input, shape index: {}]   ;;  %s677_s1 = inlined_call_operand.vmem [shape: bf16[4,36,512], index: 1, kind: input, shape index: {}]   ;;  %s678_s2 = inlined_call_operand.vmem [shape: bf16[4,3,512], index: 2, kind: output, shape index: {}]  }
   0x1   :  { %s622_s11 = smov 0  }
   0x2 LB: > { %s24_s12 = sadd.s32 1, %s595_s10  ;;  %p508_p0 = scmp.ge.s32.totalorder %s599_s11, 1  ;;  %s599_s11 = sphi %s622_s11, %s12_s11   ;;  %s595_s10 = sphi %s620_s10, %s684_s10   ;;  %s591_s9 = sphi %s618_s9, %s683_s9  }
   0x3   : > { %p26_p1 = scmp.ge.s32.totalorder %s24_s12, 4  ;;  %p142_p2 = scmp.lt.s32.totalorder %s599_s11, 5 }
   0x5   : > { %s686_s12 = smov (%p26_p1, %s24_s12), 0  ;;  %p143_p3 = pnand %p508_p0, %p142_p2 }
   0x6   : > { %p176_p4 = scmp.lt.s32.totalorder (!%p143_p3), %s591_s9, 3  ;;  %v601_v0 = vmov (!%p143_p3), 0   ;;  %vm266_vm0 = vcmask (!%p143_p3), 1041408   ;;  %vm262_vm1 = vcmask (!%p143_p3), 293888   ;;  %vm388_vm2 = vsmask.f32 (!%p143_p3), 1280 }
   0x7   : > { %146 = sbr.rel (%p143_p3) target bundleno = 252 (0xfc), region = 28  ;;  %311 = vmatprep.mubr.bf16.mxu0 (!%p143_p3), %v601_v0  ;;  %352 = vmatprep.mubr.bf16.mxu1 (!%p143_p3), %v601_v0  ;;  %vm390_vm3 = vcmask (!%p143_p3), 1043458   ;;  %vm391_vm4 = vsmask.f32 (!%p143_p3), 3328  ;;  %v602_v18 = vmov (!%p143_p3), 1983009808   ;;  %v374_v20 = vlaneseq (!%p143_p3)  ;;  %vm651_vm5 = vmand (!%p143_p3), %vm266_vm0, %vm388_vm2 }
   0x8   : > { %v372_v19 = vunpack.c.l.s4 (!%p143_p3), %v602_v18  ;;  %vm655_vm6 = vmand (!%p143_p3), %vm390_vm3, %vm391_vm4  ;;  %vm394_vm7 = vcmask (!%p143_p3), 1045508   ;;  %vm395_vm8 = vsmask.f32 (!%p143_p3), 5376  ;;  %vm398_vm11 = vcmask (!%p143_p3), 1047558  }
   0x9   : > { %v375_v24 = vshrl.u32 (!%p143_p3), %v374_v20, 7  ;;  %vm393_vm9 = vmor (!%p143_p3), %vm655_vm6, %vm651_vm5  ;;  %vm399_vm12 = vsmask.f32 (!%p143_p3), 7424 }
   0xa   : > { %v373_v23 = vunpack.c.0.s8 (!%p143_p3), %v372_v19  ;;  %vm396_vm10 = vmand (!%p143_p3), %vm394_vm7, %vm395_vm8 }
   0xb   : > { %vm397_vm13 = vmor (!%p143_p3), %vm396_vm10, %vm393_vm9 }
   0xc   : > { %v376_v27 = vsub.s32 (!%p143_p3), %v373_v23, %v375_v24  ;;  %vm400_vm14 = vmand (!%p143_p3), %vm398_vm11, %vm399_vm12 }
   0xd   : > { %vm401_vm15 = vmor (!%p143_p3), %vm400_vm14, %vm397_vm13 }
   0xe   : > { %s688_s9 = smov (!%p176_p4, %s591_s9), 3 }
   0xf   : > { %s534_s13 = smul.u32 80, %s688_s9  ;;  %s509_s17 = sshll.u32 %s688_s9, 1 }
  0x10   : > { %s179_s20 = scalar_lea.vmem %s676_s0, %s509_s17  ;;  %s533_s21 = sshll.u32 %s688_s9, 3 }
  0x11   : > { %s188_s16 = scalar_lea.vmem %s677_s1, %s534_s13  ;;  %v201_v17 = vld [vmem:[%s179_s20] sm:$0x3]  ;;  %s198_s24 = scalar_lea.vmem %s678_s2, %s533_s21 }
  0x12   : > { %v561_v1 = vld [vmem:[%s188_s16 + $0x4] ss:$16 sps:$4 sm:$0xff]   ;;  %v563_v2 = vld [vmem:[%s188_s16 + $0xc] ss:$16 sps:$4 sm:$0xff]   ;;  %v565_v3 = vld [vmem:[%s188_s16] ss:$16 sps:$4 sm:$0xff]  }
  0x13   : > { %279 = vmatprep.subr.bf16.mxu0 %v561_v1  ;;  %v566_v4 = vld [vmem:[%s188_s16 + $0x8] ss:$16 sps:$4 sm:$0xff]   ;;  %320 = vmatprep.subr.bf16.mxu1 %v563_v2  ;;  %v567_v5 = vld [vmem:[%s188_s16 + $0x24] ss:$16 sps:$4 sm:$0xff]   ;;  %v569_v6 = vld [vmem:[%s188_s16 + $0x2c] ss:$16 sps:$4 sm:$0xff]  }
  0x14   : > { %280 = vmatpush1.bf16.msra.mxu0 %v565_v3  ;;  %321 = vmatpush1.bf16.msra.mxu1 %v566_v4  ;;  %v571_v7 = vld [vmem:[%s188_s16 + $0x20] ss:$16 sps:$4 sm:$0xff]   ;;  %v572_v8 = vld [vmem:[%s188_s16 + $0x28] ss:$16 sps:$4 sm:$0xff]  }
  0x15   : > { %281 = vmatprep.subr.bf16.mxu0 %v567_v5  ;;  %v210_v9 = vld [vmem:[%s188_s16 + $0x40] sm:$0x33]  ;;  %v211_v10 = vld [vmem:[%s188_s16 + $0x48] sm:$0x33]  ;;  %322 = vmatprep.subr.bf16.mxu1 %v569_v6 }
  0x16   : > { %v522_v11 = vcombine.high %v210_v9, %v210_v9  ;;  %v524_v12 = vcombine.high %v211_v10, %v211_v10  ;;  %v521_v13 = vcombine.low %v210_v9, %v210_v9  ;;  %v523_v14 = vcombine.low %v211_v10, %v211_v10  ;;  %v402_v38 = vld [vmem:[%s198_s24] sm:$0xff] }
  0x18   : > { %282 = vmatpush1.bf16.msra.mxu0 %v571_v7  ;;  %323 = vmatpush1.bf16.msra.mxu1 %v572_v8  ;;  %v268_v15 = vsel %vm266_vm0, %v521_v13, 0  ;;  %v274_v16 = vsel %vm266_vm0, %v523_v14, 0 }
  0x19   : > { %525 = vmatprep.subr.msk.bf16.mxu0 %vm266_vm0, %v522_v11  ;;  %527 = vmatprep.subr.msk.bf16.mxu1 %vm266_vm0, %v524_v12 }
  0x1c   : > { %284 = vmatpush1.bf16.msra.mxu0 %v268_v15  ;;  %325 = vmatpush1.bf16.msra.mxu1 %v274_v16 }
  0x1f   : > { %526 = vmatmul.mubr.msk.bf16.vlgmr.msra.gmra.mrb[0].mxu0 %vm262_vm1, %v201_v17  ;;  %528 = vmatmul.mubr.msk.bf16.vlgmr.msra.gmra.mrb[0].mxu1 %vm262_vm1, %v201_v17 }
  0xf2   : > { %v313_v25 = vpop.f32.mrb[0].mxu0  ;;  %v354_v26 = vpop.f32.mrb[0].mxu1 }
  0xf3   : > { %v315_v28 = vpop.f32.mrb[1].mxu0  ;;  %v356_v29 = vpop.f32.mrb[1].mxu1 }
  0xf4   : > { %v529_v30 = vpack.c.bf16 %v315_v28, %v313_v25  ;;  %v530_v31 = vpack.c.bf16 %v356_v29, %v354_v26  ;;  %v317_v32 = vpop.f32.mrb[2].mxu0  ;;  %v358_v33 = vpop.f32.mrb[2].mxu1 }
  0xf5   : > { %v318_v34 = vpop.f32.mrb[3].mxu0  ;;  %v359_v35 = vpop.f32.mrb[3].mxu1 }
  0xf6   : > { %v377_v36 = vrot.slane %v529_v30, %v376_v27  ;;  %v384_v37 = vrot.slane %v530_v31, %v376_v27 }
  0xf8   : > { %v385_v39 = vcombine.low %v377_v36, %v384_v37 }
  0xfa   : > { %v403_v40 = vsel %vm401_vm15, %v385_v39, %v402_v38 }
  0xfb   : > { %404 = vst [vmem:[%s198_s24] sm:$0xff] %v403_v40 }
  0xfc PF: > { %s12_s11 = sadd.s32 1, %s599_s11   ;;  %s683_s9 = smov %s595_s10 }
  0xfd   : > { %p9_p5 = scmp.ge.s32.totalorder %s12_s11, 6   ;;  %s684_s10 = smov %s686_s12 }
  0xff   :  { %11 = sbr.rel (!%p9_p5) target bundleno = 2 (0x2), region = 61 }

</bundles_post_ra>
